<compile_context>
chip_gen: v5e
topology: v5e:2x2
jax: 0.10.0
libtpu: 0.0.40
codegen_flags: <defaults>
</compile_context>

<pallas_src>
import functools

import jax
import jax.numpy as jnp
from jax.experimental import pallas as pl
from jax.experimental.pallas import tpu as pltpu


# ----------------------------------------------------------------------------
# helpers
# ----------------------------------------------------------------------------
def _round_up(x, m):
    return ((x + m - 1) // m) * m


def _sublane_multiple(dtype):
    """Sublane packing multiple: f32 -> 8, bf16/f16 -> 16, 8-bit -> 32."""
    return max(8, 32 // jnp.dtype(dtype).itemsize)


def _choose_group(B, group, sublane):
    """Instances per grid step (sublane-aligned).

    Default: large blocks (up to 256) but capped near ceil(B/2) so there are at
    least 2 grid steps for the double-buffered gather to overlap with.
    """
    if group is not None:
        return _round_up(max(int(group), 1), sublane)
    g = _round_up(pl.cdiv(B, 2), sublane)
    return max(sublane, min(256, g))


def _prep_classes(classes, B, C):
    if C == 1:
        return jnp.zeros((B,), jnp.int32)                    # class-agnostic: channel 0
    return jnp.clip(classes.astype(jnp.int32), 0, C - 1)     # guard OOB class ids


# ----------------------------------------------------------------------------
# manual class-gather DMA helpers (shared by both kernels)
# ----------------------------------------------------------------------------
def _issue_gathers(cls_ref, logits_hbm, staging, sems, blk, slot, *, G, B, NB):
    """Start row gathers logits[i, cls[i]] for block `blk` into staging[slot]."""
    n_tail = B - (NB - 1) * G                 # static: valid rows in the last block
    base = blk * G
    # rows [0, n_tail) are in range for every block
    for g in range(n_tail):
        i = base + g
        c = cls_ref[i]
        pltpu.make_async_copy(logits_hbm.at[i, c], staging.at[slot, g],
                              sems.at[slot, g]).start()
    # rows [n_tail, G) only exist for non-final blocks (skip duplicate tail DMAs)
    if n_tail < G:
        @pl.when(blk < NB - 1)
        def _():
            for g in range(n_tail, G):
                i = base + g
                c = cls_ref[i]
                pltpu.make_async_copy(logits_hbm.at[i, c], staging.at[slot, g],
                                      sems.at[slot, g]).start()


def _wait_gathers(logits_hbm, staging, sems, blk, slot, *, G, B, NB):
    """Wait for block `blk`'s gathers in staging[slot] (mirrors _issue_gathers)."""
    n_tail = B - (NB - 1) * G
    for g in range(n_tail):
        pltpu.make_async_copy(logits_hbm.at[0, 0], staging.at[slot, g],
                              sems.at[slot, g]).wait()
    if n_tail < G:
        @pl.when(blk < NB - 1)
        def _():
            for g in range(n_tail, G):
                pltpu.make_async_copy(logits_hbm.at[0, 0], staging.at[slot, g],
                                      sems.at[slot, g]).wait()


# ----------------------------------------------------------------------------
# Inference kernel: per-instance class gather + sigmoid, G instances per step
# ----------------------------------------------------------------------------
def _mask_inference_kernel(cls_ref, logits_hbm, out_ref, staging, sems, *, G, B, NB):
    s = pl.program_id(0)
    slot = s % 2
    nxt_slot = (s + 1) % 2

    # prime the pipeline: fetch block 0 into slot 0 at the first grid step
    @pl.when(s == 0)
    def _():
        _issue_gathers(cls_ref, logits_hbm, staging, sems, s, slot, G=G, B=B, NB=NB)

    # prefetch block s+1 (reads its cls scalars + issues DMAs) BEFORE waiting on block s
    @pl.when(s + 1 < NB)
    def _():
        _issue_gathers(cls_ref, logits_hbm, staging, sems, s + 1, nxt_slot,
                       G=G, B=B, NB=NB)

    _wait_gathers(logits_hbm, staging, sems, s, slot, G=G, B=B, NB=NB)

    x = staging[slot].astype(jnp.float32)                    # (G, HW)
    out_ref[...] = jax.nn.sigmoid(x).astype(out_ref.dtype)   # tail rows masked by Pallas


def mask_rcnn_inference_pallas(pred_mask_logits, pred_classes, *, instance_block=None):
    """Soft masks of shape (B, 1, H, W), gathered at pred_classes."""
    B, C, H, W = pred_mask_logits.shape
    if B == 0:
        return jnp.zeros((0, 1, H, W), pred_mask_logits.dtype)
    HW = H * W
    sub = _sublane_multiple(pred_mask_logits.dtype)
    G = _choose_group(B, instance_block, sub)
    NB = pl.cdiv(B, G)

    classes = _prep_classes(pred_classes, B, C)
    logits2d = pred_mask_logits.reshape(B, C, HW)             # lane-dense layout

    kernel = functools.partial(_mask_inference_kernel, G=G, B=B, NB=NB)
    grid_spec = pltpu.PrefetchScalarGridSpec(
        num_scalar_prefetch=1,
        grid=(NB,),
        in_specs=[pl.BlockSpec(memory_space=pl.ANY)],         # logits stay in HBM
        out_specs=pl.BlockSpec((G, HW), lambda s, cls: (s, 0)),
        scratch_shapes=[
            pltpu.VMEM((2, G, HW), pred_mask_logits.dtype),   # double-buffered staging
            pltpu.SemaphoreType.DMA((2, G)),
        ],
    )
    out = pl.pallas_call(
        kernel,
        out_shape=jax.ShapeDtypeStruct((B, HW), pred_mask_logits.dtype),
        grid_spec=grid_spec,
        # "arbitrary": the grid carries double-buffer DMA state across iterations.
        compiler_params=pltpu.CompilerParams(dimension_semantics=("arbitrary",)),
    )(classes, logits2d)
    return out.reshape(B, 1, H, W)


# ----------------------------------------------------------------------------
# Training kernel: gathered BCE-with-logits, per-block partial sums
# ----------------------------------------------------------------------------
def _mask_loss_kernel(cls_ref, logits_hbm, gt_ref, partial_ref, staging, sems,
                      *, G, B, NB):
    s = pl.program_id(0)
    slot = s % 2
    nxt_slot = (s + 1) % 2

    @pl.when(s == 0)
    def _():
        _issue_gathers(cls_ref, logits_hbm, staging, sems, s, slot, G=G, B=B, NB=NB)

    @pl.when(s + 1 < NB)
    def _():
        _issue_gathers(cls_ref, logits_hbm, staging, sems, s + 1, nxt_slot,
                       G=G, B=B, NB=NB)

    _wait_gathers(logits_hbm, staging, sems, s, slot, G=G, B=B, NB=NB)

    x = staging[slot].astype(jnp.float32)                     # (G, HW) gathered logits
    y = gt_ref[...].astype(jnp.float32)                       # (G, HW) gt mask in {0,1}
    # numerically-stable binary_cross_entropy_with_logits
    per = jnp.maximum(x, 0.0) - x * y + jnp.log1p(jnp.exp(-jnp.abs(x)))
    # reduce per-row first, then mask only the cheap (G, 1) row sums
    row_sum = jnp.sum(per, axis=-1, keepdims=True)            # (G, 1)
    rows = jax.lax.broadcasted_iota(jnp.int32, row_sum.shape, 0) + s * G
    row_sum = jnp.where(rows < B, row_sum, 0.0)               # zero padded tail rows
    block_sum = jnp.sum(row_sum)
    # per-block partial sum broadcast into a full (1, 8, 128) tile
    partial_ref[...] = jnp.full(partial_ref.shape, block_sum, dtype=partial_ref.dtype)


def mask_rcnn_loss_pallas(pred_mask_logits, gt_classes, gt_masks, loss_weight=1.0,
                          *, instance_block=None):
    """Scalar: loss_weight * BCEWithLogits(logits[i, gt_classes[i]], gt_masks).mean()."""
    B, C, H, W = pred_mask_logits.shape
    assert H == W, "Mask prediction must be square!"
    if B == 0:
        # detectron2 returns logits.sum() * 0 for an empty batch
        return jnp.sum(pred_mask_logits) * 0.0
    HW = H * W

    gt2d = gt_masks.reshape(B, HW)                            # keep narrow dtype (no f32 cast)
    if gt2d.dtype == jnp.bool_:
        gt2d = gt2d.astype(jnp.bfloat16)                      # narrow, exact for {0,1}

    sub = max(_sublane_multiple(pred_mask_logits.dtype), _sublane_multiple(gt2d.dtype))
    G = _choose_group(B, instance_block, sub)
    NB = pl.cdiv(B, G)

    classes = _prep_classes(gt_classes, B, C)
    logits2d = pred_mask_logits.reshape(B, C, HW)

    kernel = functools.partial(_mask_loss_kernel, G=G, B=B, NB=NB)
    grid_spec = pltpu.PrefetchScalarGridSpec(
        num_scalar_prefetch=1,
        grid=(NB,),
        in_specs=[
            pl.BlockSpec(memory_space=pl.ANY),                # logits (B, C, HW) in HBM
            pl.BlockSpec((G, HW), lambda s, cls: (s, 0)),     # gt masks, auto-pipelined
        ],
        out_specs=pl.BlockSpec((1, 8, 128), lambda s, cls: (s, 0, 0)),
        scratch_shapes=[
            pltpu.VMEM((2, G, HW), pred_mask_logits.dtype),   # double-buffered staging
            pltpu.SemaphoreType.DMA((2, G)),
        ],
    )
    partials = pl.pallas_call(
        kernel,
        out_shape=jax.ShapeDtypeStruct((NB, 8, 128), jnp.float32),
        grid_spec=grid_spec,
        compiler_params=pltpu.CompilerParams(dimension_semantics=("arbitrary",)),
    )(classes, logits2d, gt2d)

    inv_count = 1.0 / float(B * H * W)
    return jnp.sum(partials[:, 0, 0]) * (inv_count * float(loss_weight))


# ----------------------------------------------------------------------------
# BaseMaskRCNNHead (JAX/Pallas)
# ----------------------------------------------------------------------------
class BaseMaskRCNNHeadPallas:
    def __init__(self, loss_weight: float = 1.0, vis_period: int = 0):
        self.loss_weight = loss_weight
        self.vis_period = vis_period
        # TODO(synk): event-storage metrics (accuracy / fp / fn) and vis dumps are host-side
        # bookkeeping with no kernel equivalent; only the loss / mask tensors are computed.

    def layers(self, x):
        # Abstract in the reference base class (no parameters in __init__).
        return x

    def forward(self, x, *, training, gt_classes=None, gt_masks=None,
                pred_classes=None, instance_block=None):
        x = self.layers(x)
        if training:
            loss = mask_rcnn_loss_pallas(x, gt_classes, gt_masks, self.loss_weight,
                                         instance_block=instance_block)
            return {"loss_mask": loss}
        else:
            return mask_rcnn_inference_pallas(x, pred_classes,
                                              instance_block=instance_block)


# ----------------------------------------------------------------------------
# Reference (plain JAX) for verification
# ----------------------------------------------------------------------------
def _ref_loss(logits, classes, gt_masks, loss_weight):
    B = logits.shape[0]
    sel = logits[jnp.arange(B), classes]                      # (B, H, W)
    y = gt_masks.astype(jnp.float32)
    per = jnp.maximum(sel, 0.0) - sel * y + jnp.log1p(jnp.exp(-jnp.abs(sel)))
    return jnp.mean(per) * loss_weight


def _ref_inference(logits, classes):
    B = logits.shape[0]
    sel = logits[jnp.arange(B), classes]                      # (B, H, W)
    return jax.nn.sigmoid(sel)[:, None]                       # (B, 1, H, W)


if __name__ == "__main__":
    key = jax.random.PRNGKey(0)
    head = BaseMaskRCNNHeadPallas(loss_weight=1.0, vis_period=0)

    # (B, C, H, W, instance_block, bool_gt): cover ragged single block (B < G),
    # multi-step pipeline with ragged tail, non-128-multiple H*W, class-agnostic
    # (C == 1) with bool gt (bf16 path, sublane 16), and the default group size.
    cases = [
        (6, 4, 16, 16, 8, False),
        (20, 4, 28, 28, 8, False),
        (5, 1, 16, 16, None, True),
        (40, 3, 16, 16, None, False),
    ]

    for case_idx, (B, C, H, W, g, bool_gt) in enumerate(cases):
        key, k1, k2, k3, k4 = jax.random.split(key, 5)
        x = jax.random.normal(k1, (B, C, H, W), dtype=jnp.float32)
        gt_classes = jax.random.randint(k2, (B,), 0, C, dtype=jnp.int32)
        gt_bits = jax.random.uniform(k3, (B, H, W)) > 0.5
        gt_masks = gt_bits if bool_gt else gt_bits.astype(jnp.float32)
        pred_classes = jax.random.randint(k4, (B,), 0, C, dtype=jnp.int32)

        cls_l = gt_classes if C > 1 else jnp.zeros((B,), jnp.int32)
        cls_i = pred_classes if C > 1 else jnp.zeros((B,), jnp.int32)

        # Training path
        losses = head.forward(x, training=True, gt_classes=gt_classes,
                              gt_masks=gt_masks, instance_block=g)
        loss = jax.block_until_ready(losses["loss_mask"])
        ref_l = _ref_loss(x, cls_l, gt_masks, 1.0)
        assert jnp.allclose(loss, ref_l, rtol=2e-5, atol=1e-5), (case_idx, loss, ref_l)

        # Inference path
        masks = head.forward(x, training=False, pred_classes=pred_classes,
                             instance_block=g)
        masks = jax.block_until_ready(masks)
        ref_m = _ref_inference(x, cls_i)
        assert masks.shape == (B, 1, H, W)
        assert jnp.allclose(masks, ref_m, rtol=1e-5, atol=1e-5), case_idx

    # Empty-batch guard (B == 0)
    x0 = jnp.zeros((0, 4, 16, 16), jnp.float32)
    l0 = mask_rcnn_loss_pallas(x0, jnp.zeros((0,), jnp.int32),
                               jnp.zeros((0, 16, 16), jnp.float32))
    assert jax.block_until_ready(l0) == 0.0
    m0 = mask_rcnn_inference_pallas(x0, jnp.zeros((0,), jnp.int32))
    assert jax.block_until_ready(m0).shape == (0, 1, 16, 16)

    print("KERNEL_OK")
</pallas_src>

<mosaic_0001>
module attributes {stable_mosaic.version = 11 : i64} {
  func.func @_mask_loss_kernel(%arg0: i32, %arg1: memref<6xi32, #tpu.memory_space<smem>>, %arg2: memref<6x4x256xf32, #tpu.memory_space<any>>, %arg3: memref<8x256xf32, #tpu.memory_space<vmem>>, %arg4: memref<1x8x128xf32, #tpu.memory_space<vmem>>, %arg5: memref<2x8x256xf32, #tpu.memory_space<vmem>>, %arg6: memref<2x8x!tpu.dma_semaphore, #tpu.memory_space<semaphore_mem>>) attributes {dimension_semantics = [#tpu.dimension_semantics<arbitrary>], iteration_bounds = array<i64: 1>, scalar_prefetch = 1 : i64, scratch_operands = 2 : i64, tpu.core_type = #tpu.core_type<tc>, window_params = [{}, {transform_indices = @transform_1, window_bounds = array<i64: 8, 256>}, {transform_indices = @transform_2, window_bounds = array<i64: 1, 8, 128>}]} {
    %c2_i32 = arith.constant 2 : i32
    %c0_i32 = arith.constant 0 : i32
    %0 = arith.cmpi eq, %c2_i32, %c0_i32 : i32
    %c1_i32 = arith.constant 1 : i32
    %1 = arith.select %0, %c1_i32, %c2_i32 : i32
    %2 = arith.remsi %arg0, %1 : i32
    %c0_i32_0 = arith.constant 0 : i32
    %3 = arith.cmpi ne, %2, %c0_i32_0 : i32
    %c0_i32_1 = arith.constant 0 : i32
    %4 = arith.cmpi slt, %2, %c0_i32_1 : i32
    %c0_i32_2 = arith.constant 0 : i32
    %5 = arith.cmpi slt, %1, %c0_i32_2 : i32
    %6 = arith.xori %4, %5 : i1
    %7 = arith.andi %6, %3 : i1
    %8 = arith.addi %2, %1 : i32
    %9 = arith.select %7, %8, %2 : i32
    %c1_i32_3 = arith.constant 1 : i32
    %10 = arith.addi %arg0, %c1_i32_3 : i32
    %c2_i32_4 = arith.constant 2 : i32
    %c0_i32_5 = arith.constant 0 : i32
    %11 = arith.cmpi eq, %c2_i32_4, %c0_i32_5 : i32
    %c1_i32_6 = arith.constant 1 : i32
    %12 = arith.select %11, %c1_i32_6, %c2_i32_4 : i32
    %13 = arith.remsi %10, %12 : i32
    %c0_i32_7 = arith.constant 0 : i32
    %14 = arith.cmpi ne, %13, %c0_i32_7 : i32
    %c0_i32_8 = arith.constant 0 : i32
    %15 = arith.cmpi slt, %13, %c0_i32_8 : i32
    %c0_i32_9 = arith.constant 0 : i32
    %16 = arith.cmpi slt, %12, %c0_i32_9 : i32
    %17 = arith.xori %15, %16 : i1
    %18 = arith.andi %17, %14 : i1
    %19 = arith.addi %13, %12 : i32
    %20 = arith.select %18, %19, %13 : i32
    %c0_i32_10 = arith.constant 0 : i32
    %21 = arith.cmpi eq, %arg0, %c0_i32_10 : i32
    %22 = arith.extui %21 : i1 to i32
    %c0_i32_11 = arith.constant 0 : i32
    %23 = arith.cmpi ne, %22, %c0_i32_11 : i32
    scf.if %23 {
      %c8_i32_60 = arith.constant 8 : i32
      %97 = arith.muli %arg0, %c8_i32_60 : i32
      %c0_i32_61 = arith.constant 0 : i32
      %98 = arith.addi %97, %c0_i32_61 : i32
      %99 = arith.index_cast %98 : i32 to index
      %100 = memref.load %arg1[%99] : memref<6xi32, #tpu.memory_space<smem>>
      %c0_i32_62 = arith.constant 0 : i32
      %c0_i32_63 = arith.constant 0 : i32
      %c0_i32_64 = arith.constant 0 : i32
      %101 = tpu.memref_slice %arg2[%98, %100, %c0_i32_64] : memref<6x4x256xf32, #tpu.memory_space<any>> -> memref<1x1x256xf32, #tpu.memory_space<any>>
      %102 = tpu.memref_squeeze %101 : memref<1x1x256xf32, #tpu.memory_space<any>> -> memref<256xf32, #tpu.memory_space<any>>
      %c0_i32_65 = arith.constant 0 : i32
      %103 = tpu.memref_slice %arg5[%9, %c0_i32_62, %c0_i32_65] : memref<2x8x256xf32, #tpu.memory_space<vmem>> -> memref<1x1x256xf32, #tpu.memory_space<vmem>>
      %104 = tpu.memref_squeeze %103 : memref<1x1x256xf32, #tpu.memory_space<vmem>> -> memref<256xf32, #tpu.memory_space<vmem>>
      %105 = tpu.memref_slice %arg6[%9, %c0_i32_63] : memref<2x8x!tpu.dma_semaphore, #tpu.memory_space<semaphore_mem>> -> memref<1x1x!tpu.dma_semaphore, #tpu.memory_space<semaphore_mem>>
      %106 = tpu.memref_squeeze %105 : memref<1x1x!tpu.dma_semaphore, #tpu.memory_space<semaphore_mem>> -> memref<!tpu.dma_semaphore, #tpu.memory_space<semaphore_mem>>
      tpu.enqueue_dma source(%102 : memref<256xf32, #tpu.memory_space<any>>) target(%104 : memref<256xf32, #tpu.memory_space<vmem>>) target_semaphore(%106 : memref<!tpu.dma_semaphore, #tpu.memory_space<semaphore_mem>>)
      %c1_i32_66 = arith.constant 1 : i32
      %107 = arith.addi %97, %c1_i32_66 : i32
      %108 = arith.index_cast %107 : i32 to index
      %109 = memref.load %arg1[%108] : memref<6xi32, #tpu.memory_space<smem>>
      %c1_i32_67 = arith.constant 1 : i32
      %c1_i32_68 = arith.constant 1 : i32
      %c0_i32_69 = arith.constant 0 : i32
      %110 = tpu.memref_slice %arg2[%107, %109, %c0_i32_69] : memref<6x4x256xf32, #tpu.memory_space<any>> -> memref<1x1x256xf32, #tpu.memory_space<any>>
      %111 = tpu.memref_squeeze %110 : memref<1x1x256xf32, #tpu.memory_space<any>> -> memref<256xf32, #tpu.memory_space<any>>
      %c0_i32_70 = arith.constant 0 : i32
      %112 = tpu.memref_slice %arg5[%9, %c1_i32_67, %c0_i32_70] : memref<2x8x256xf32, #tpu.memory_space<vmem>> -> memref<1x1x256xf32, #tpu.memory_space<vmem>>
      %113 = tpu.memref_squeeze %112 : memref<1x1x256xf32, #tpu.memory_space<vmem>> -> memref<256xf32, #tpu.memory_space<vmem>>
      %114 = tpu.memref_slice %arg6[%9, %c1_i32_68] : memref<2x8x!tpu.dma_semaphore, #tpu.memory_space<semaphore_mem>> -> memref<1x1x!tpu.dma_semaphore, #tpu.memory_space<semaphore_mem>>
      %115 = tpu.memref_squeeze %114 : memref<1x1x!tpu.dma_semaphore, #tpu.memory_space<semaphore_mem>> -> memref<!tpu.dma_semaphore, #tpu.memory_space<semaphore_mem>>
      tpu.enqueue_dma source(%111 : memref<256xf32, #tpu.memory_space<any>>) target(%113 : memref<256xf32, #tpu.memory_space<vmem>>) target_semaphore(%115 : memref<!tpu.dma_semaphore, #tpu.memory_space<semaphore_mem>>)
      %c2_i32_71 = arith.constant 2 : i32
      %116 = arith.addi %97, %c2_i32_71 : i32
      %117 = arith.index_cast %116 : i32 to index
      %118 = memref.load %arg1[%117] : memref<6xi32, #tpu.memory_space<smem>>
      %c2_i32_72 = arith.constant 2 : i32
      %c2_i32_73 = arith.constant 2 : i32
      %c0_i32_74 = arith.constant 0 : i32
      %119 = tpu.memref_slice %arg2[%116, %118, %c0_i32_74] : memref<6x4x256xf32, #tpu.memory_space<any>> -> memref<1x1x256xf32, #tpu.memory_space<any>>
      %120 = tpu.memref_squeeze %119 : memref<1x1x256xf32, #tpu.memory_space<any>> -> memref<256xf32, #tpu.memory_space<any>>
      %c0_i32_75 = arith.constant 0 : i32
      %121 = tpu.memref_slice %arg5[%9, %c2_i32_72, %c0_i32_75] : memref<2x8x256xf32, #tpu.memory_space<vmem>> -> memref<1x1x256xf32, #tpu.memory_space<vmem>>
      %122 = tpu.memref_squeeze %121 : memref<1x1x256xf32, #tpu.memory_space<vmem>> -> memref<256xf32, #tpu.memory_space<vmem>>
      %123 = tpu.memref_slice %arg6[%9, %c2_i32_73] : memref<2x8x!tpu.dma_semaphore, #tpu.memory_space<semaphore_mem>> -> memref<1x1x!tpu.dma_semaphore, #tpu.memory_space<semaphore_mem>>
      %124 = tpu.memref_squeeze %123 : memref<1x1x!tpu.dma_semaphore, #tpu.memory_space<semaphore_mem>> -> memref<!tpu.dma_semaphore, #tpu.memory_space<semaphore_mem>>
      tpu.enqueue_dma source(%120 : memref<256xf32, #tpu.memory_space<any>>) target(%122 : memref<256xf32, #tpu.memory_space<vmem>>) target_semaphore(%124 : memref<!tpu.dma_semaphore, #tpu.memory_space<semaphore_mem>>)
      %c3_i32_76 = arith.constant 3 : i32
      %125 = arith.addi %97, %c3_i32_76 : i32
      %126 = arith.index_cast %125 : i32 to index
      %127 = memref.load %arg1[%126] : memref<6xi32, #tpu.memory_space<smem>>
      %c3_i32_77 = arith.constant 3 : i32
      %c3_i32_78 = arith.constant 3 : i32
      %c0_i32_79 = arith.constant 0 : i32
      %128 = tpu.memref_slice %arg2[%125, %127, %c0_i32_79] : memref<6x4x256xf32, #tpu.memory_space<any>> -> memref<1x1x256xf32, #tpu.memory_space<any>>
      %129 = tpu.memref_squeeze %128 : memref<1x1x256xf32, #tpu.memory_space<any>> -> memref<256xf32, #tpu.memory_space<any>>
      %c0_i32_80 = arith.constant 0 : i32
      %130 = tpu.memref_slice %arg5[%9, %c3_i32_77, %c0_i32_80] : memref<2x8x256xf32, #tpu.memory_space<vmem>> -> memref<1x1x256xf32, #tpu.memory_space<vmem>>
      %131 = tpu.memref_squeeze %130 : memref<1x1x256xf32, #tpu.memory_space<vmem>> -> memref<256xf32, #tpu.memory_space<vmem>>
      %132 = tpu.memref_slice %arg6[%9, %c3_i32_78] : memref<2x8x!tpu.dma_semaphore, #tpu.memory_space<semaphore_mem>> -> memref<1x1x!tpu.dma_semaphore, #tpu.memory_space<semaphore_mem>>
      %133 = tpu.memref_squeeze %132 : memref<1x1x!tpu.dma_semaphore, #tpu.memory_space<semaphore_mem>> -> memref<!tpu.dma_semaphore, #tpu.memory_space<semaphore_mem>>
      tpu.enqueue_dma source(%129 : memref<256xf32, #tpu.memory_space<any>>) target(%131 : memref<256xf32, #tpu.memory_space<vmem>>) target_semaphore(%133 : memref<!tpu.dma_semaphore, #tpu.memory_space<semaphore_mem>>)
      %c4_i32_81 = arith.constant 4 : i32
      %134 = arith.addi %97, %c4_i32_81 : i32
      %135 = arith.index_cast %134 : i32 to index
      %136 = memref.load %arg1[%135] : memref<6xi32, #tpu.memory_space<smem>>
      %c4_i32_82 = arith.constant 4 : i32
      %c4_i32_83 = arith.constant 4 : i32
      %c0_i32_84 = arith.constant 0 : i32
      %137 = tpu.memref_slice %arg2[%134, %136, %c0_i32_84] : memref<6x4x256xf32, #tpu.memory_space<any>> -> memref<1x1x256xf32, #tpu.memory_space<any>>
      %138 = tpu.memref_squeeze %137 : memref<1x1x256xf32, #tpu.memory_space<any>> -> memref<256xf32, #tpu.memory_space<any>>
      %c0_i32_85 = arith.constant 0 : i32
      %139 = tpu.memref_slice %arg5[%9, %c4_i32_82, %c0_i32_85] : memref<2x8x256xf32, #tpu.memory_space<vmem>> -> memref<1x1x256xf32, #tpu.memory_space<vmem>>
      %140 = tpu.memref_squeeze %139 : memref<1x1x256xf32, #tpu.memory_space<vmem>> -> memref<256xf32, #tpu.memory_space<vmem>>
      %141 = tpu.memref_slice %arg6[%9, %c4_i32_83] : memref<2x8x!tpu.dma_semaphore, #tpu.memory_space<semaphore_mem>> -> memref<1x1x!tpu.dma_semaphore, #tpu.memory_space<semaphore_mem>>
      %142 = tpu.memref_squeeze %141 : memref<1x1x!tpu.dma_semaphore, #tpu.memory_space<semaphore_mem>> -> memref<!tpu.dma_semaphore, #tpu.memory_space<semaphore_mem>>
      tpu.enqueue_dma source(%138 : memref<256xf32, #tpu.memory_space<any>>) target(%140 : memref<256xf32, #tpu.memory_space<vmem>>) target_semaphore(%142 : memref<!tpu.dma_semaphore, #tpu.memory_space<semaphore_mem>>)
      %c5_i32_86 = arith.constant 5 : i32
      %143 = arith.addi %97, %c5_i32_86 : i32
      %144 = arith.index_cast %143 : i32 to index
      %145 = memref.load %arg1[%144] : memref<6xi32, #tpu.memory_space<smem>>
      %c5_i32_87 = arith.constant 5 : i32
      %c5_i32_88 = arith.constant 5 : i32
      %c0_i32_89 = arith.constant 0 : i32
      %146 = tpu.memref_slice %arg2[%143, %145, %c0_i32_89] : memref<6x4x256xf32, #tpu.memory_space<any>> -> memref<1x1x256xf32, #tpu.memory_space<any>>
      %147 = tpu.memref_squeeze %146 : memref<1x1x256xf32, #tpu.memory_space<any>> -> memref<256xf32, #tpu.memory_space<any>>
      %c0_i32_90 = arith.constant 0 : i32
      %148 = tpu.memref_slice %arg5[%9, %c5_i32_87, %c0_i32_90] : memref<2x8x256xf32, #tpu.memory_space<vmem>> -> memref<1x1x256xf32, #tpu.memory_space<vmem>>
      %149 = tpu.memref_squeeze %148 : memref<1x1x256xf32, #tpu.memory_space<vmem>> -> memref<256xf32, #tpu.memory_space<vmem>>
      %150 = tpu.memref_slice %arg6[%9, %c5_i32_88] : memref<2x8x!tpu.dma_semaphore, #tpu.memory_space<semaphore_mem>> -> memref<1x1x!tpu.dma_semaphore, #tpu.memory_space<semaphore_mem>>
      %151 = tpu.memref_squeeze %150 : memref<1x1x!tpu.dma_semaphore, #tpu.memory_space<semaphore_mem>> -> memref<!tpu.dma_semaphore, #tpu.memory_space<semaphore_mem>>
      tpu.enqueue_dma source(%147 : memref<256xf32, #tpu.memory_space<any>>) target(%149 : memref<256xf32, #tpu.memory_space<vmem>>) target_semaphore(%151 : memref<!tpu.dma_semaphore, #tpu.memory_space<semaphore_mem>>)
      %c0_i32_91 = arith.constant 0 : i32
      %152 = arith.cmpi slt, %arg0, %c0_i32_91 : i32
      %153 = arith.extui %152 : i1 to i32
      %c0_i32_92 = arith.constant 0 : i32
      %154 = arith.cmpi ne, %153, %c0_i32_92 : i32
      scf.if %154 {
        %c6_i32_93 = arith.constant 6 : i32
        %155 = arith.addi %97, %c6_i32_93 : i32
        %156 = arith.index_cast %155 : i32 to index
        %157 = memref.load %arg1[%156] : memref<6xi32, #tpu.memory_space<smem>>
        %c6_i32_94 = arith.constant 6 : i32
        %c6_i32_95 = arith.constant 6 : i32
        %c0_i32_96 = arith.constant 0 : i32
        %158 = tpu.memref_slice %arg2[%155, %157, %c0_i32_96] : memref<6x4x256xf32, #tpu.memory_space<any>> -> memref<1x1x256xf32, #tpu.memory_space<any>>
        %159 = tpu.memref_squeeze %158 : memref<1x1x256xf32, #tpu.memory_space<any>> -> memref<256xf32, #tpu.memory_space<any>>
        %c0_i32_97 = arith.constant 0 : i32
        %160 = tpu.memref_slice %arg5[%9, %c6_i32_94, %c0_i32_97] : memref<2x8x256xf32, #tpu.memory_space<vmem>> -> memref<1x1x256xf32, #tpu.memory_space<vmem>>
        %161 = tpu.memref_squeeze %160 : memref<1x1x256xf32, #tpu.memory_space<vmem>> -> memref<256xf32, #tpu.memory_space<vmem>>
        %162 = tpu.memref_slice %arg6[%9, %c6_i32_95] : memref<2x8x!tpu.dma_semaphore, #tpu.memory_space<semaphore_mem>> -> memref<1x1x!tpu.dma_semaphore, #tpu.memory_space<semaphore_mem>>
        %163 = tpu.memref_squeeze %162 : memref<1x1x!tpu.dma_semaphore, #tpu.memory_space<semaphore_mem>> -> memref<!tpu.dma_semaphore, #tpu.memory_space<semaphore_mem>>
        tpu.enqueue_dma source(%159 : memref<256xf32, #tpu.memory_space<any>>) target(%161 : memref<256xf32, #tpu.memory_space<vmem>>) target_semaphore(%163 : memref<!tpu.dma_semaphore, #tpu.memory_space<semaphore_mem>>)
        %c7_i32 = arith.constant 7 : i32
        %164 = arith.addi %97, %c7_i32 : i32
        %165 = arith.index_cast %164 : i32 to index
        %166 = memref.load %arg1[%165] : memref<6xi32, #tpu.memory_space<smem>>
        %c7_i32_98 = arith.constant 7 : i32
        %c7_i32_99 = arith.constant 7 : i32
        %c0_i32_100 = arith.constant 0 : i32
        %167 = tpu.memref_slice %arg2[%164, %166, %c0_i32_100] : memref<6x4x256xf32, #tpu.memory_space<any>> -> memref<1x1x256xf32, #tpu.memory_space<any>>
        %168 = tpu.memref_squeeze %167 : memref<1x1x256xf32, #tpu.memory_space<any>> -> memref<256xf32, #tpu.memory_space<any>>
        %c0_i32_101 = arith.constant 0 : i32
        %169 = tpu.memref_slice %arg5[%9, %c7_i32_98, %c0_i32_101] : memref<2x8x256xf32, #tpu.memory_space<vmem>> -> memref<1x1x256xf32, #tpu.memory_space<vmem>>
        %170 = tpu.memref_squeeze %169 : memref<1x1x256xf32, #tpu.memory_space<vmem>> -> memref<256xf32, #tpu.memory_space<vmem>>
        %171 = tpu.memref_slice %arg6[%9, %c7_i32_99] : memref<2x8x!tpu.dma_semaphore, #tpu.memory_space<semaphore_mem>> -> memref<1x1x!tpu.dma_semaphore, #tpu.memory_space<semaphore_mem>>
        %172 = tpu.memref_squeeze %171 : memref<1x1x!tpu.dma_semaphore, #tpu.memory_space<semaphore_mem>> -> memref<!tpu.dma_semaphore, #tpu.memory_space<semaphore_mem>>
        tpu.enqueue_dma source(%168 : memref<256xf32, #tpu.memory_space<any>>) target(%170 : memref<256xf32, #tpu.memory_space<vmem>>) target_semaphore(%172 : memref<!tpu.dma_semaphore, #tpu.memory_space<semaphore_mem>>)
      } else {
      }
    } else {
    }
    %c1_i32_12 = arith.constant 1 : i32
    %24 = arith.addi %arg0, %c1_i32_12 : i32
    %c1_i32_13 = arith.constant 1 : i32
    %25 = arith.cmpi slt, %24, %c1_i32_13 : i32
    %26 = arith.extui %25 : i1 to i32
    %c0_i32_14 = arith.constant 0 : i32
    %27 = arith.cmpi ne, %26, %c0_i32_14 : i32
    scf.if %27 {
      %c1_i32_60 = arith.constant 1 : i32
      %97 = arith.addi %arg0, %c1_i32_60 : i32
      %c8_i32_61 = arith.constant 8 : i32
      %98 = arith.muli %97, %c8_i32_61 : i32
      %c0_i32_62 = arith.constant 0 : i32
      %99 = arith.addi %98, %c0_i32_62 : i32
      %100 = arith.index_cast %99 : i32 to index
      %101 = memref.load %arg1[%100] : memref<6xi32, #tpu.memory_space<smem>>
      %c0_i32_63 = arith.constant 0 : i32
      %c0_i32_64 = arith.constant 0 : i32
      %c0_i32_65 = arith.constant 0 : i32
      %102 = tpu.memref_slice %arg2[%99, %101, %c0_i32_65] : memref<6x4x256xf32, #tpu.memory_space<any>> -> memref<1x1x256xf32, #tpu.memory_space<any>>
      %103 = tpu.memref_squeeze %102 : memref<1x1x256xf32, #tpu.memory_space<any>> -> memref<256xf32, #tpu.memory_space<any>>
      %c0_i32_66 = arith.constant 0 : i32
      %104 = tpu.memref_slice %arg5[%20, %c0_i32_63, %c0_i32_66] : memref<2x8x256xf32, #tpu.memory_space<vmem>> -> memref<1x1x256xf32, #tpu.memory_space<vmem>>
      %105 = tpu.memref_squeeze %104 : memref<1x1x256xf32, #tpu.memory_space<vmem>> -> memref<256xf32, #tpu.memory_space<vmem>>
      %106 = tpu.memref_slice %arg6[%20, %c0_i32_64] : memref<2x8x!tpu.dma_semaphore, #tpu.memory_space<semaphore_mem>> -> memref<1x1x!tpu.dma_semaphore, #tpu.memory_space<semaphore_mem>>
      %107 = tpu.memref_squeeze %106 : memref<1x1x!tpu.dma_semaphore, #tpu.memory_space<semaphore_mem>> -> memref<!tpu.dma_semaphore, #tpu.memory_space<semaphore_mem>>
      tpu.enqueue_dma source(%103 : memref<256xf32, #tpu.memory_space<any>>) target(%105 : memref<256xf32, #tpu.memory_space<vmem>>) target_semaphore(%107 : memref<!tpu.dma_semaphore, #tpu.memory_space<semaphore_mem>>)
      %c1_i32_67 = arith.constant 1 : i32
      %108 = arith.addi %98, %c1_i32_67 : i32
      %109 = arith.index_cast %108 : i32 to index
      %110 = memref.load %arg1[%109] : memref<6xi32, #tpu.memory_space<smem>>
      %c1_i32_68 = arith.constant 1 : i32
      %c1_i32_69 = arith.constant 1 : i32
      %c0_i32_70 = arith.constant 0 : i32
      %111 = tpu.memref_slice %arg2[%108, %110, %c0_i32_70] : memref<6x4x256xf32, #tpu.memory_space<any>> -> memref<1x1x256xf32, #tpu.memory_space<any>>
      %112 = tpu.memref_squeeze %111 : memref<1x1x256xf32, #tpu.memory_space<any>> -> memref<256xf32, #tpu.memory_space<any>>
      %c0_i32_71 = arith.constant 0 : i32
      %113 = tpu.memref_slice %arg5[%20, %c1_i32_68, %c0_i32_71] : memref<2x8x256xf32, #tpu.memory_space<vmem>> -> memref<1x1x256xf32, #tpu.memory_space<vmem>>
      %114 = tpu.memref_squeeze %113 : memref<1x1x256xf32, #tpu.memory_space<vmem>> -> memref<256xf32, #tpu.memory_space<vmem>>
      %115 = tpu.memref_slice %arg6[%20, %c1_i32_69] : memref<2x8x!tpu.dma_semaphore, #tpu.memory_space<semaphore_mem>> -> memref<1x1x!tpu.dma_semaphore, #tpu.memory_space<semaphore_mem>>
      %116 = tpu.memref_squeeze %115 : memref<1x1x!tpu.dma_semaphore, #tpu.memory_space<semaphore_mem>> -> memref<!tpu.dma_semaphore, #tpu.memory_space<semaphore_mem>>
      tpu.enqueue_dma source(%112 : memref<256xf32, #tpu.memory_space<any>>) target(%114 : memref<256xf32, #tpu.memory_space<vmem>>) target_semaphore(%116 : memref<!tpu.dma_semaphore, #tpu.memory_space<semaphore_mem>>)
      %c2_i32_72 = arith.constant 2 : i32
      %117 = arith.addi %98, %c2_i32_72 : i32
      %118 = arith.index_cast %117 : i32 to index
      %119 = memref.load %arg1[%118] : memref<6xi32, #tpu.memory_space<smem>>
      %c2_i32_73 = arith.constant 2 : i32
      %c2_i32_74 = arith.constant 2 : i32
      %c0_i32_75 = arith.constant 0 : i32
      %120 = tpu.memref_slice %arg2[%117, %119, %c0_i32_75] : memref<6x4x256xf32, #tpu.memory_space<any>> -> memref<1x1x256xf32, #tpu.memory_space<any>>
      %121 = tpu.memref_squeeze %120 : memref<1x1x256xf32, #tpu.memory_space<any>> -> memref<256xf32, #tpu.memory_space<any>>
      %c0_i32_76 = arith.constant 0 : i32
      %122 = tpu.memref_slice %arg5[%20, %c2_i32_73, %c0_i32_76] : memref<2x8x256xf32, #tpu.memory_space<vmem>> -> memref<1x1x256xf32, #tpu.memory_space<vmem>>
      %123 = tpu.memref_squeeze %122 : memref<1x1x256xf32, #tpu.memory_space<vmem>> -> memref<256xf32, #tpu.memory_space<vmem>>
      %124 = tpu.memref_slice %arg6[%20, %c2_i32_74] : memref<2x8x!tpu.dma_semaphore, #tpu.memory_space<semaphore_mem>> -> memref<1x1x!tpu.dma_semaphore, #tpu.memory_space<semaphore_mem>>
      %125 = tpu.memref_squeeze %124 : memref<1x1x!tpu.dma_semaphore, #tpu.memory_space<semaphore_mem>> -> memref<!tpu.dma_semaphore, #tpu.memory_space<semaphore_mem>>
      tpu.enqueue_dma source(%121 : memref<256xf32, #tpu.memory_space<any>>) target(%123 : memref<256xf32, #tpu.memory_space<vmem>>) target_semaphore(%125 : memref<!tpu.dma_semaphore, #tpu.memory_space<semaphore_mem>>)
      %c3_i32_77 = arith.constant 3 : i32
      %126 = arith.addi %98, %c3_i32_77 : i32
      %127 = arith.index_cast %126 : i32 to index
      %128 = memref.load %arg1[%127] : memref<6xi32, #tpu.memory_space<smem>>
      %c3_i32_78 = arith.constant 3 : i32
      %c3_i32_79 = arith.constant 3 : i32
      %c0_i32_80 = arith.constant 0 : i32
      %129 = tpu.memref_slice %arg2[%126, %128, %c0_i32_80] : memref<6x4x256xf32, #tpu.memory_space<any>> -> memref<1x1x256xf32, #tpu.memory_space<any>>
      %130 = tpu.memref_squeeze %129 : memref<1x1x256xf32, #tpu.memory_space<any>> -> memref<256xf32, #tpu.memory_space<any>>
      %c0_i32_81 = arith.constant 0 : i32
      %131 = tpu.memref_slice %arg5[%20, %c3_i32_78, %c0_i32_81] : memref<2x8x256xf32, #tpu.memory_space<vmem>> -> memref<1x1x256xf32, #tpu.memory_space<vmem>>
      %132 = tpu.memref_squeeze %131 : memref<1x1x256xf32, #tpu.memory_space<vmem>> -> memref<256xf32, #tpu.memory_space<vmem>>
      %133 = tpu.memref_slice %arg6[%20, %c3_i32_79] : memref<2x8x!tpu.dma_semaphore, #tpu.memory_space<semaphore_mem>> -> memref<1x1x!tpu.dma_semaphore, #tpu.memory_space<semaphore_mem>>
      %134 = tpu.memref_squeeze %133 : memref<1x1x!tpu.dma_semaphore, #tpu.memory_space<semaphore_mem>> -> memref<!tpu.dma_semaphore, #tpu.memory_space<semaphore_mem>>
      tpu.enqueue_dma source(%130 : memref<256xf32, #tpu.memory_space<any>>) target(%132 : memref<256xf32, #tpu.memory_space<vmem>>) target_semaphore(%134 : memref<!tpu.dma_semaphore, #tpu.memory_space<semaphore_mem>>)
      %c4_i32_82 = arith.constant 4 : i32
      %135 = arith.addi %98, %c4_i32_82 : i32
      %136 = arith.index_cast %135 : i32 to index
      %137 = memref.load %arg1[%136] : memref<6xi32, #tpu.memory_space<smem>>
      %c4_i32_83 = arith.constant 4 : i32
      %c4_i32_84 = arith.constant 4 : i32
      %c0_i32_85 = arith.constant 0 : i32
      %138 = tpu.memref_slice %arg2[%135, %137, %c0_i32_85] : memref<6x4x256xf32, #tpu.memory_space<any>> -> memref<1x1x256xf32, #tpu.memory_space<any>>
      %139 = tpu.memref_squeeze %138 : memref<1x1x256xf32, #tpu.memory_space<any>> -> memref<256xf32, #tpu.memory_space<any>>
      %c0_i32_86 = arith.constant 0 : i32
      %140 = tpu.memref_slice %arg5[%20, %c4_i32_83, %c0_i32_86] : memref<2x8x256xf32, #tpu.memory_space<vmem>> -> memref<1x1x256xf32, #tpu.memory_space<vmem>>
      %141 = tpu.memref_squeeze %140 : memref<1x1x256xf32, #tpu.memory_space<vmem>> -> memref<256xf32, #tpu.memory_space<vmem>>
      %142 = tpu.memref_slice %arg6[%20, %c4_i32_84] : memref<2x8x!tpu.dma_semaphore, #tpu.memory_space<semaphore_mem>> -> memref<1x1x!tpu.dma_semaphore, #tpu.memory_space<semaphore_mem>>
      %143 = tpu.memref_squeeze %142 : memref<1x1x!tpu.dma_semaphore, #tpu.memory_space<semaphore_mem>> -> memref<!tpu.dma_semaphore, #tpu.memory_space<semaphore_mem>>
      tpu.enqueue_dma source(%139 : memref<256xf32, #tpu.memory_space<any>>) target(%141 : memref<256xf32, #tpu.memory_space<vmem>>) target_semaphore(%143 : memref<!tpu.dma_semaphore, #tpu.memory_space<semaphore_mem>>)
      %c5_i32_87 = arith.constant 5 : i32
      %144 = arith.addi %98, %c5_i32_87 : i32
      %145 = arith.index_cast %144 : i32 to index
      %146 = memref.load %arg1[%145] : memref<6xi32, #tpu.memory_space<smem>>
      %c5_i32_88 = arith.constant 5 : i32
      %c5_i32_89 = arith.constant 5 : i32
      %c0_i32_90 = arith.constant 0 : i32
      %147 = tpu.memref_slice %arg2[%144, %146, %c0_i32_90] : memref<6x4x256xf32, #tpu.memory_space<any>> -> memref<1x1x256xf32, #tpu.memory_space<any>>
      %148 = tpu.memref_squeeze %147 : memref<1x1x256xf32, #tpu.memory_space<any>> -> memref<256xf32, #tpu.memory_space<any>>
      %c0_i32_91 = arith.constant 0 : i32
      %149 = tpu.memref_slice %arg5[%20, %c5_i32_88, %c0_i32_91] : memref<2x8x256xf32, #tpu.memory_space<vmem>> -> memref<1x1x256xf32, #tpu.memory_space<vmem>>
      %150 = tpu.memref_squeeze %149 : memref<1x1x256xf32, #tpu.memory_space<vmem>> -> memref<256xf32, #tpu.memory_space<vmem>>
      %151 = tpu.memref_slice %arg6[%20, %c5_i32_89] : memref<2x8x!tpu.dma_semaphore, #tpu.memory_space<semaphore_mem>> -> memref<1x1x!tpu.dma_semaphore, #tpu.memory_space<semaphore_mem>>
      %152 = tpu.memref_squeeze %151 : memref<1x1x!tpu.dma_semaphore, #tpu.memory_space<semaphore_mem>> -> memref<!tpu.dma_semaphore, #tpu.memory_space<semaphore_mem>>
      tpu.enqueue_dma source(%148 : memref<256xf32, #tpu.memory_space<any>>) target(%150 : memref<256xf32, #tpu.memory_space<vmem>>) target_semaphore(%152 : memref<!tpu.dma_semaphore, #tpu.memory_space<semaphore_mem>>)
      %c0_i32_92 = arith.constant 0 : i32
      %153 = arith.cmpi slt, %97, %c0_i32_92 : i32
      %154 = arith.extui %153 : i1 to i32
      %c0_i32_93 = arith.constant 0 : i32
      %155 = arith.cmpi ne, %154, %c0_i32_93 : i32
      scf.if %155 {
        %c6_i32_94 = arith.constant 6 : i32
        %156 = arith.addi %98, %c6_i32_94 : i32
        %157 = arith.index_cast %156 : i32 to index
        %158 = memref.load %arg1[%157] : memref<6xi32, #tpu.memory_space<smem>>
        %c6_i32_95 = arith.constant 6 : i32
        %c6_i32_96 = arith.constant 6 : i32
        %c0_i32_97 = arith.constant 0 : i32
        %159 = tpu.memref_slice %arg2[%156, %158, %c0_i32_97] : memref<6x4x256xf32, #tpu.memory_space<any>> -> memref<1x1x256xf32, #tpu.memory_space<any>>
        %160 = tpu.memref_squeeze %159 : memref<1x1x256xf32, #tpu.memory_space<any>> -> memref<256xf32, #tpu.memory_space<any>>
        %c0_i32_98 = arith.constant 0 : i32
        %161 = tpu.memref_slice %arg5[%20, %c6_i32_95, %c0_i32_98] : memref<2x8x256xf32, #tpu.memory_space<vmem>> -> memref<1x1x256xf32, #tpu.memory_space<vmem>>
        %162 = tpu.memref_squeeze %161 : memref<1x1x256xf32, #tpu.memory_space<vmem>> -> memref<256xf32, #tpu.memory_space<vmem>>
        %163 = tpu.memref_slice %arg6[%20, %c6_i32_96] : memref<2x8x!tpu.dma_semaphore, #tpu.memory_space<semaphore_mem>> -> memref<1x1x!tpu.dma_semaphore, #tpu.memory_space<semaphore_mem>>
        %164 = tpu.memref_squeeze %163 : memref<1x1x!tpu.dma_semaphore, #tpu.memory_space<semaphore_mem>> -> memref<!tpu.dma_semaphore, #tpu.memory_space<semaphore_mem>>
        tpu.enqueue_dma source(%160 : memref<256xf32, #tpu.memory_space<any>>) target(%162 : memref<256xf32, #tpu.memory_space<vmem>>) target_semaphore(%164 : memref<!tpu.dma_semaphore, #tpu.memory_space<semaphore_mem>>)
        %c7_i32 = arith.constant 7 : i32
        %165 = arith.addi %98, %c7_i32 : i32
        %166 = arith.index_cast %165 : i32 to index
        %167 = memref.load %arg1[%166] : memref<6xi32, #tpu.memory_space<smem>>
        %c7_i32_99 = arith.constant 7 : i32
        %c7_i32_100 = arith.constant 7 : i32
        %c0_i32_101 = arith.constant 0 : i32
        %168 = tpu.memref_slice %arg2[%165, %167, %c0_i32_101] : memref<6x4x256xf32, #tpu.memory_space<any>> -> memref<1x1x256xf32, #tpu.memory_space<any>>
        %169 = tpu.memref_squeeze %168 : memref<1x1x256xf32, #tpu.memory_space<any>> -> memref<256xf32, #tpu.memory_space<any>>
        %c0_i32_102 = arith.constant 0 : i32
        %170 = tpu.memref_slice %arg5[%20, %c7_i32_99, %c0_i32_102] : memref<2x8x256xf32, #tpu.memory_space<vmem>> -> memref<1x1x256xf32, #tpu.memory_space<vmem>>
        %171 = tpu.memref_squeeze %170 : memref<1x1x256xf32, #tpu.memory_space<vmem>> -> memref<256xf32, #tpu.memory_space<vmem>>
        %172 = tpu.memref_slice %arg6[%20, %c7_i32_100] : memref<2x8x!tpu.dma_semaphore, #tpu.memory_space<semaphore_mem>> -> memref<1x1x!tpu.dma_semaphore, #tpu.memory_space<semaphore_mem>>
        %173 = tpu.memref_squeeze %172 : memref<1x1x!tpu.dma_semaphore, #tpu.memory_space<semaphore_mem>> -> memref<!tpu.dma_semaphore, #tpu.memory_space<semaphore_mem>>
        tpu.enqueue_dma source(%169 : memref<256xf32, #tpu.memory_space<any>>) target(%171 : memref<256xf32, #tpu.memory_space<vmem>>) target_semaphore(%173 : memref<!tpu.dma_semaphore, #tpu.memory_space<semaphore_mem>>)
      } else {
      }
    } else {
    }
    %c0_i32_15 = arith.constant 0 : i32
    %c0_i32_16 = arith.constant 0 : i32
    %c0_i32_17 = arith.constant 0 : i32
    %c0_i32_18 = arith.constant 0 : i32
    %c0_i32_19 = arith.constant 0 : i32
    %28 = tpu.memref_slice %arg2[%c0_i32_15, %c0_i32_16, %c0_i32_19] : memref<6x4x256xf32, #tpu.memory_space<any>> -> memref<1x1x256xf32, #tpu.memory_space<any>>
    %29 = tpu.memref_squeeze %28 : memref<1x1x256xf32, #tpu.memory_space<any>> -> memref<256xf32, #tpu.memory_space<any>>
    %c0_i32_20 = arith.constant 0 : i32
    %30 = tpu.memref_slice %arg5[%9, %c0_i32_17, %c0_i32_20] : memref<2x8x256xf32, #tpu.memory_space<vmem>> -> memref<1x1x256xf32, #tpu.memory_space<vmem>>
    %31 = tpu.memref_squeeze %30 : memref<1x1x256xf32, #tpu.memory_space<vmem>> -> memref<256xf32, #tpu.memory_space<vmem>>
    %32 = tpu.memref_slice %arg6[%9, %c0_i32_18] : memref<2x8x!tpu.dma_semaphore, #tpu.memory_space<semaphore_mem>> -> memref<1x1x!tpu.dma_semaphore, #tpu.memory_space<semaphore_mem>>
    %33 = tpu.memref_squeeze %32 : memref<1x1x!tpu.dma_semaphore, #tpu.memory_space<semaphore_mem>> -> memref<!tpu.dma_semaphore, #tpu.memory_space<semaphore_mem>>
    tpu.wait_dma2 semaphore(%33 : memref<!tpu.dma_semaphore, #tpu.memory_space<semaphore_mem>>) src(%29 : memref<256xf32, #tpu.memory_space<any>>) dst(%31 : memref<256xf32, #tpu.memory_space<vmem>>)
    %c0_i32_21 = arith.constant 0 : i32
    %c0_i32_22 = arith.constant 0 : i32
    %c1_i32_23 = arith.constant 1 : i32
    %c1_i32_24 = arith.constant 1 : i32
    %c0_i32_25 = arith.constant 0 : i32
    %34 = tpu.memref_slice %arg2[%c0_i32_21, %c0_i32_22, %c0_i32_25] : memref<6x4x256xf32, #tpu.memory_space<any>> -> memref<1x1x256xf32, #tpu.memory_space<any>>
    %35 = tpu.memref_squeeze %34 : memref<1x1x256xf32, #tpu.memory_space<any>> -> memref<256xf32, #tpu.memory_space<any>>
    %c0_i32_26 = arith.constant 0 : i32
    %36 = tpu.memref_slice %arg5[%9, %c1_i32_23, %c0_i32_26] : memref<2x8x256xf32, #tpu.memory_space<vmem>> -> memref<1x1x256xf32, #tpu.memory_space<vmem>>
    %37 = tpu.memref_squeeze %36 : memref<1x1x256xf32, #tpu.memory_space<vmem>> -> memref<256xf32, #tpu.memory_space<vmem>>
    %38 = tpu.memref_slice %arg6[%9, %c1_i32_24] : memref<2x8x!tpu.dma_semaphore, #tpu.memory_space<semaphore_mem>> -> memref<1x1x!tpu.dma_semaphore, #tpu.memory_space<semaphore_mem>>
    %39 = tpu.memref_squeeze %38 : memref<1x1x!tpu.dma_semaphore, #tpu.memory_space<semaphore_mem>> -> memref<!tpu.dma_semaphore, #tpu.memory_space<semaphore_mem>>
    tpu.wait_dma2 semaphore(%39 : memref<!tpu.dma_semaphore, #tpu.memory_space<semaphore_mem>>) src(%35 : memref<256xf32, #tpu.memory_space<any>>) dst(%37 : memref<256xf32, #tpu.memory_space<vmem>>)
    %c0_i32_27 = arith.constant 0 : i32
    %c0_i32_28 = arith.constant 0 : i32
    %c2_i32_29 = arith.constant 2 : i32
    %c2_i32_30 = arith.constant 2 : i32
    %c0_i32_31 = arith.constant 0 : i32
    %40 = tpu.memref_slice %arg2[%c0_i32_27, %c0_i32_28, %c0_i32_31] : memref<6x4x256xf32, #tpu.memory_space<any>> -> memref<1x1x256xf32, #tpu.memory_space<any>>
    %41 = tpu.memref_squeeze %40 : memref<1x1x256xf32, #tpu.memory_space<any>> -> memref<256xf32, #tpu.memory_space<any>>
    %c0_i32_32 = arith.constant 0 : i32
    %42 = tpu.memref_slice %arg5[%9, %c2_i32_29, %c0_i32_32] : memref<2x8x256xf32, #tpu.memory_space<vmem>> -> memref<1x1x256xf32, #tpu.memory_space<vmem>>
    %43 = tpu.memref_squeeze %42 : memref<1x1x256xf32, #tpu.memory_space<vmem>> -> memref<256xf32, #tpu.memory_space<vmem>>
    %44 = tpu.memref_slice %arg6[%9, %c2_i32_30] : memref<2x8x!tpu.dma_semaphore, #tpu.memory_space<semaphore_mem>> -> memref<1x1x!tpu.dma_semaphore, #tpu.memory_space<semaphore_mem>>
    %45 = tpu.memref_squeeze %44 : memref<1x1x!tpu.dma_semaphore, #tpu.memory_space<semaphore_mem>> -> memref<!tpu.dma_semaphore, #tpu.memory_space<semaphore_mem>>
    tpu.wait_dma2 semaphore(%45 : memref<!tpu.dma_semaphore, #tpu.memory_space<semaphore_mem>>) src(%41 : memref<256xf32, #tpu.memory_space<any>>) dst(%43 : memref<256xf32, #tpu.memory_space<vmem>>)
    %c0_i32_33 = arith.constant 0 : i32
    %c0_i32_34 = arith.constant 0 : i32
    %c3_i32 = arith.constant 3 : i32
    %c3_i32_35 = arith.constant 3 : i32
    %c0_i32_36 = arith.constant 0 : i32
    %46 = tpu.memref_slice %arg2[%c0_i32_33, %c0_i32_34, %c0_i32_36] : memref<6x4x256xf32, #tpu.memory_space<any>> -> memref<1x1x256xf32, #tpu.memory_space<any>>
    %47 = tpu.memref_squeeze %46 : memref<1x1x256xf32, #tpu.memory_space<any>> -> memref<256xf32, #tpu.memory_space<any>>
    %c0_i32_37 = arith.constant 0 : i32
    %48 = tpu.memref_slice %arg5[%9, %c3_i32, %c0_i32_37] : memref<2x8x256xf32, #tpu.memory_space<vmem>> -> memref<1x1x256xf32, #tpu.memory_space<vmem>>
    %49 = tpu.memref_squeeze %48 : memref<1x1x256xf32, #tpu.memory_space<vmem>> -> memref<256xf32, #tpu.memory_space<vmem>>
    %50 = tpu.memref_slice %arg6[%9, %c3_i32_35] : memref<2x8x!tpu.dma_semaphore, #tpu.memory_space<semaphore_mem>> -> memref<1x1x!tpu.dma_semaphore, #tpu.memory_space<semaphore_mem>>
    %51 = tpu.memref_squeeze %50 : memref<1x1x!tpu.dma_semaphore, #tpu.memory_space<semaphore_mem>> -> memref<!tpu.dma_semaphore, #tpu.memory_space<semaphore_mem>>
    tpu.wait_dma2 semaphore(%51 : memref<!tpu.dma_semaphore, #tpu.memory_space<semaphore_mem>>) src(%47 : memref<256xf32, #tpu.memory_space<any>>) dst(%49 : memref<256xf32, #tpu.memory_space<vmem>>)
    %c0_i32_38 = arith.constant 0 : i32
    %c0_i32_39 = arith.constant 0 : i32
    %c4_i32 = arith.constant 4 : i32
    %c4_i32_40 = arith.constant 4 : i32
    %c0_i32_41 = arith.constant 0 : i32
    %52 = tpu.memref_slice %arg2[%c0_i32_38, %c0_i32_39, %c0_i32_41] : memref<6x4x256xf32, #tpu.memory_space<any>> -> memref<1x1x256xf32, #tpu.memory_space<any>>
    %53 = tpu.memref_squeeze %52 : memref<1x1x256xf32, #tpu.memory_space<any>> -> memref<256xf32, #tpu.memory_space<any>>
    %c0_i32_42 = arith.constant 0 : i32
    %54 = tpu.memref_slice %arg5[%9, %c4_i32, %c0_i32_42] : memref<2x8x256xf32, #tpu.memory_space<vmem>> -> memref<1x1x256xf32, #tpu.memory_space<vmem>>
    %55 = tpu.memref_squeeze %54 : memref<1x1x256xf32, #tpu.memory_space<vmem>> -> memref<256xf32, #tpu.memory_space<vmem>>
    %56 = tpu.memref_slice %arg6[%9, %c4_i32_40] : memref<2x8x!tpu.dma_semaphore, #tpu.memory_space<semaphore_mem>> -> memref<1x1x!tpu.dma_semaphore, #tpu.memory_space<semaphore_mem>>
    %57 = tpu.memref_squeeze %56 : memref<1x1x!tpu.dma_semaphore, #tpu.memory_space<semaphore_mem>> -> memref<!tpu.dma_semaphore, #tpu.memory_space<semaphore_mem>>
    tpu.wait_dma2 semaphore(%57 : memref<!tpu.dma_semaphore, #tpu.memory_space<semaphore_mem>>) src(%53 : memref<256xf32, #tpu.memory_space<any>>) dst(%55 : memref<256xf32, #tpu.memory_space<vmem>>)
    %c0_i32_43 = arith.constant 0 : i32
    %c0_i32_44 = arith.constant 0 : i32
    %c5_i32 = arith.constant 5 : i32
    %c5_i32_45 = arith.constant 5 : i32
    %c0_i32_46 = arith.constant 0 : i32
    %58 = tpu.memref_slice %arg2[%c0_i32_43, %c0_i32_44, %c0_i32_46] : memref<6x4x256xf32, #tpu.memory_space<any>> -> memref<1x1x256xf32, #tpu.memory_space<any>>
    %59 = tpu.memref_squeeze %58 : memref<1x1x256xf32, #tpu.memory_space<any>> -> memref<256xf32, #tpu.memory_space<any>>
    %c0_i32_47 = arith.constant 0 : i32
    %60 = tpu.memref_slice %arg5[%9, %c5_i32, %c0_i32_47] : memref<2x8x256xf32, #tpu.memory_space<vmem>> -> memref<1x1x256xf32, #tpu.memory_space<vmem>>
    %61 = tpu.memref_squeeze %60 : memref<1x1x256xf32, #tpu.memory_space<vmem>> -> memref<256xf32, #tpu.memory_space<vmem>>
    %62 = tpu.memref_slice %arg6[%9, %c5_i32_45] : memref<2x8x!tpu.dma_semaphore, #tpu.memory_space<semaphore_mem>> -> memref<1x1x!tpu.dma_semaphore, #tpu.memory_space<semaphore_mem>>
    %63 = tpu.memref_squeeze %62 : memref<1x1x!tpu.dma_semaphore, #tpu.memory_space<semaphore_mem>> -> memref<!tpu.dma_semaphore, #tpu.memory_space<semaphore_mem>>
    tpu.wait_dma2 semaphore(%63 : memref<!tpu.dma_semaphore, #tpu.memory_space<semaphore_mem>>) src(%59 : memref<256xf32, #tpu.memory_space<any>>) dst(%61 : memref<256xf32, #tpu.memory_space<vmem>>)
    %c0_i32_48 = arith.constant 0 : i32
    %64 = arith.cmpi slt, %arg0, %c0_i32_48 : i32
    %65 = arith.extui %64 : i1 to i32
    %c0_i32_49 = arith.constant 0 : i32
    %66 = arith.cmpi ne, %65, %c0_i32_49 : i32
    scf.if %66 {
      %c0_i32_60 = arith.constant 0 : i32
      %c0_i32_61 = arith.constant 0 : i32
      %c6_i32_62 = arith.constant 6 : i32
      %c6_i32_63 = arith.constant 6 : i32
      %c0_i32_64 = arith.constant 0 : i32
      %97 = tpu.memref_slice %arg2[%c0_i32_60, %c0_i32_61, %c0_i32_64] : memref<6x4x256xf32, #tpu.memory_space<any>> -> memref<1x1x256xf32, #tpu.memory_space<any>>
      %98 = tpu.memref_squeeze %97 : memref<1x1x256xf32, #tpu.memory_space<any>> -> memref<256xf32, #tpu.memory_space<any>>
      %c0_i32_65 = arith.constant 0 : i32
      %99 = tpu.memref_slice %arg5[%9, %c6_i32_62, %c0_i32_65] : memref<2x8x256xf32, #tpu.memory_space<vmem>> -> memref<1x1x256xf32, #tpu.memory_space<vmem>>
      %100 = tpu.memref_squeeze %99 : memref<1x1x256xf32, #tpu.memory_space<vmem>> -> memref<256xf32, #tpu.memory_space<vmem>>
      %101 = tpu.memref_slice %arg6[%9, %c6_i32_63] : memref<2x8x!tpu.dma_semaphore, #tpu.memory_space<semaphore_mem>> -> memref<1x1x!tpu.dma_semaphore, #tpu.memory_space<semaphore_mem>>
      %102 = tpu.memref_squeeze %101 : memref<1x1x!tpu.dma_semaphore, #tpu.memory_space<semaphore_mem>> -> memref<!tpu.dma_semaphore, #tpu.memory_space<semaphore_mem>>
      tpu.wait_dma2 semaphore(%102 : memref<!tpu.dma_semaphore, #tpu.memory_space<semaphore_mem>>) src(%98 : memref<256xf32, #tpu.memory_space<any>>) dst(%100 : memref<256xf32, #tpu.memory_space<vmem>>)
      %c0_i32_66 = arith.constant 0 : i32
      %c0_i32_67 = arith.constant 0 : i32
      %c7_i32 = arith.constant 7 : i32
      %c7_i32_68 = arith.constant 7 : i32
      %c0_i32_69 = arith.constant 0 : i32
      %103 = tpu.memref_slice %arg2[%c0_i32_66, %c0_i32_67, %c0_i32_69] : memref<6x4x256xf32, #tpu.memory_space<any>> -> memref<1x1x256xf32, #tpu.memory_space<any>>
      %104 = tpu.memref_squeeze %103 : memref<1x1x256xf32, #tpu.memory_space<any>> -> memref<256xf32, #tpu.memory_space<any>>
      %c0_i32_70 = arith.constant 0 : i32
      %105 = tpu.memref_slice %arg5[%9, %c7_i32, %c0_i32_70] : memref<2x8x256xf32, #tpu.memory_space<vmem>> -> memref<1x1x256xf32, #tpu.memory_space<vmem>>
      %106 = tpu.memref_squeeze %105 : memref<1x1x256xf32, #tpu.memory_space<vmem>> -> memref<256xf32, #tpu.memory_space<vmem>>
      %107 = tpu.memref_slice %arg6[%9, %c7_i32_68] : memref<2x8x!tpu.dma_semaphore, #tpu.memory_space<semaphore_mem>> -> memref<1x1x!tpu.dma_semaphore, #tpu.memory_space<semaphore_mem>>
      %108 = tpu.memref_squeeze %107 : memref<1x1x!tpu.dma_semaphore, #tpu.memory_space<semaphore_mem>> -> memref<!tpu.dma_semaphore, #tpu.memory_space<semaphore_mem>>
      tpu.wait_dma2 semaphore(%108 : memref<!tpu.dma_semaphore, #tpu.memory_space<semaphore_mem>>) src(%104 : memref<256xf32, #tpu.memory_space<any>>) dst(%106 : memref<256xf32, #tpu.memory_space<vmem>>)
    } else {
    }
    %67 = arith.index_cast %9 : i32 to index
    %c0 = arith.constant 0 : index
    %c0_50 = arith.constant 0 : index
    %68 = vector.load %arg5[%67, %c0, %c0_50] : memref<2x8x256xf32, #tpu.memory_space<vmem>>, vector<1x8x256xf32>
    %69 = vector.shape_cast %68 : vector<1x8x256xf32> to vector<8x256xf32>
    %c0_51 = arith.constant 0 : index
    %c0_52 = arith.constant 0 : index
    %70 = vector.load %arg3[%c0_51, %c0_52] : memref<8x256xf32, #tpu.memory_space<vmem>>, vector<8x256xf32>
    %cst = arith.constant 0.000000e+00 : f32
    %71 = vector.broadcast %cst : f32 to vector<8x256xf32>
    %72 = arith.maximumf %69, %71 : vector<8x256xf32>
    %73 = arith.mulf %69, %70 : vector<8x256xf32>
    %74 = arith.subf %72, %73 : vector<8x256xf32>
    %75 = math.absf %69 : vector<8x256xf32>
    %cst_53 = arith.constant 0.000000e+00 : f32
    %76 = vector.broadcast %cst_53 : f32 to vector<8x256xf32>
    %77 = arith.subf %76, %75 : vector<8x256xf32>
    %78 = math.exp %77 : vector<8x256xf32>
    %79 = math.log1p %78 : vector<8x256xf32>
    %80 = arith.addf %74, %79 : vector<8x256xf32>
    %cst_54 = arith.constant dense<0.000000e+00> : vector<8xf32>
    %81 = vector.multi_reduction <add>, %80, %cst_54 [1] : vector<8x256xf32> to vector<8xf32>
    %82 = vector.shape_cast %81 : vector<8xf32> to vector<8x1xf32>
    %83 = tpu.iota {dimensions = array<i32: 0>} : vector<8x1xi32>
    %c8_i32 = arith.constant 8 : i32
    %84 = arith.muli %arg0, %c8_i32 : i32
    %85 = vector.broadcast %84 : i32 to vector<8x1xi32>
    %86 = arith.addi %83, %85 : vector<8x1xi32>
    %c6_i32 = arith.constant 6 : i32
    %87 = vector.broadcast %c6_i32 : i32 to vector<8x1xi32>
    %88 = arith.cmpi slt, %86, %87 : vector<8x1xi32>
    %cst_55 = arith.constant 0.000000e+00 : f32
    %89 = vector.broadcast %cst_55 : f32 to vector<8x1xf32>
    %90 = arith.select %88, %82, %89 : vector<8x1xi1>, vector<8x1xf32>
    %91 = vector.shape_cast %90 : vector<8x1xf32> to vector<1x8x1xf32>
    %cst_56 = arith.constant dense<0.000000e+00> : vector<1xf32>
    %92 = vector.multi_reduction <add>, %91, %cst_56 [1, 2] : vector<1x8x1xf32> to vector<1xf32>
    %93 = vector.shape_cast %92 : vector<1xf32> to vector<1x1x1xf32>
    %94 = vector.extract %93[0, 0, 0] : f32 from vector<1x1x1xf32>
    %95 = vector.broadcast %94 : f32 to vector<1x8x128xf32>
    %c0_57 = arith.constant 0 : index
    %c0_58 = arith.constant 0 : index
    %c0_59 = arith.constant 0 : index
    %96 = vector.load %arg4[%c0_57, %c0_58, %c0_59] : memref<1x8x128xf32, #tpu.memory_space<vmem>>, vector<1x8x128xf32>
    tpu.vector_store %arg4[%c0_57, %c0_58, %c0_59], %95 {strides = array<i32>} : memref<1x8x128xf32, #tpu.memory_space<vmem>>, vector<1x8x128xf32>,
    return
  }
  func.func @transform_1(%arg0: i32, %arg1: memref<6xi32, #tpu.memory_space<smem>>) -> (i32, i32) {
    %c0_i32 = arith.constant 0 : i32
    %c0_i32_0 = arith.constant 0 : i32
    return %arg0, %c0_i32 : i32, i32
  }
  func.func @transform_2(%arg0: i32, %arg1: memref<6xi32, #tpu.memory_space<smem>>) -> (i32, i32, i32) {
    %c0_i32 = arith.constant 0 : i32
    %c0_i32_0 = arith.constant 0 : i32
    %c0_i32_1 = arith.constant 0 : i32
    return %arg0, %c0_i32, %c0_i32_0 : i32, i32, i32
  }
}

</mosaic_0001>

<bundles_post_ra>
// kernel: tpu_custom_call.1
= control target key start
LH: loop header
LB: loop body
LE: loop exit
PB: predicated region body
PF: predicated region fallthrough
CT: control target
= control target key end

     0   :  { %s1105_s15 = smov [#allocation5]   ;;  %s1247_s0 = inlined_call_operand.hbm [shape: s32[6], index: 0, kind: input, shape index: {}]   ;;  %s1248_s1 = inlined_call_operand.hbm [shape: f32[6,4,256], index: 1, kind: input, shape index: {}]   ;;  %s1249_s2 = inlined_call_operand.hbm [shape: f32[6,256], index: 2, kind: input, shape index: {}]   ;;  %s1250_s3 = inlined_call_operand.hbm [shape: f32[1,8,128], index: 3, kind: output, shape index: {}]  }
   0x1   :  { %s9_s14 = sshll.u32 %s1247_s0, 4  ;;  %s10_s14 = int_to_ptr.hbm [resolvable:$true] %s9_s14 }
   0x2   :  { %12 = dma.hbm_to_smem %s10_s14, 16, %s1105_s15, [#allocation4] }
   0x3   :  { %1087 = dma.done.wait [#allocation4], 16 }
   0x4   :  { %1088 = vsyncadd [#allocation4], 4294967280 }
   0x5   :  { %15 = sfence }
   0x6   :  { %16 = vsyncpa [#allocation7], 0 }
   0x7   :  { %17 = vsyncpa [#allocation8], 0  ;;  %s23_s18 = sshll.u32 %s1249_s2, 4  ;;  %s1106_s19 = smov [#allocation6]   ;;  %s24_s18 = int_to_ptr.hbm [resolvable:$true] %s23_s18 }
   0x8   :  { %s25_s20 = sshll.u32 %s1106_s19, 4  ;;  %s26_s20 = int_to_ptr.vmem [resolvable:$true] %s25_s20 }
   0x9   :  { %28 = dma.hbm_to_vmem [thread:$0]  %s24_s18, 256, %s26_s20, [#allocation7]  }
   0xa   :  { %1089 = dma.done.wait [#allocation7], 256  }
   0xb   :  { %1090 = vsyncadd [#allocation7], 4294967040  ;;  %s59_s0 = sld [smem:[#allocation5]]  ;;  %s1107_s21 = smov [#allocation2]  }
   0xc   :  { %s1143_s22 = sshll.u32 %s1107_s21, 4  ;;  %s815_s23 = sld [smem:[#allocation5 + $0x1]]  ;;  %s74_s22 = int_to_ptr.vmem [resolvable:$true] %s1143_s22 }
   0xd   :  { %s1146_s24 = sld [smem:[#allocation5 + $0x2]]  ;;  %s1108_s25 = smov [#allocation2 + $0x1]  }
   0xe   :  { %s1148_s26 = sshll.u32 %s1108_s25, 4  ;;  %s1109_s2 = smov [#allocation2 + $0x2]   ;;  %s95_s26 = int_to_ptr.vmem [resolvable:$true] %s1148_s26 }
   0xf   :  { %s1151_s27 = sshll.u32 %s1109_s2, 4  ;;  %s1160_s17 = scalar_lea.hbm %s1248_s1, 48  ;;  %s116_s27 = int_to_ptr.vmem [resolvable:$true] %s1151_s27 }
  0x11   :  { %s60_s28 = sshrl.u32 %s59_s0, 2  ;;  %s61_s29 = sand.u32 3, %s59_s0  }
  0x12   :  { %s814_s30 = sshll.u32 %s60_s28, 3  ;;  %s81_s5 = sshrl.u32 %s815_s23, 2 }
  0x13   :  { %s63_s4 = sadd.s32 %s814_s30, %s61_s29  ;;  %s82_s9 = sand.u32 3, %s815_s23  }
  0x14   :  { %s66_s8 = scalar_lea.hbm %s1248_s1, %s63_s4  ;;  %s816_s11 = sshll.u32 %s81_s5, 3 }
  0x15   :  { %s71_s10 = sshll.u32 %s66_s8, 4  ;;  %s642_s12 = sadd.s32 %s816_s11, %s82_s9  ;;  %s72_s10 = int_to_ptr.hbm [resolvable:$true] %s71_s10 }
  0x16   :  { %s919_s13 = sshra.s32 %s72_s10, 4  ;;  %s920_s13 = int_to_ptr.hbm [resolvable:$true] %s919_s13 }
  0x17   :  { %s921_s14 = scalar_lea.hbm %s920_s13, 2  ;;  %p924_p1 = scmp.lt.s32.totalorder %s920_s13, %s1248_s1 }
  0x18   :  { %p922_p0 = scmp.ne.s32.totalorder %s920_s13, %s921_s14  ;;  %p925_p2 = scmp.lt.s32.totalorder %s1160_s17, %s921_s14 }
  0x1a   :  { %p926_p3 = por %p925_p2, %p924_p1 }
  0x1c   :  { %p927_p4 = pnand %p926_p3, %p922_p0 }
  0x1e   :  { %930 = shalt.err (!%p927_p4)  }
  0x1f   :  { %s1110_s20 = smov 64   ;;  %s1111_s0 = smov 128  }
  0x20   :  { %s1112_s21 = smov 1   ;;  %s643_s2 = scalar_lea.hbm %s1248_s1, %s642_s12 }
  0x21   :  { %78 = dma.hbm_to_vmem [thread:$0]  %s72_s10, 32, %s74_s22, [#allocation3], %s1110_s20, %s1111_s0, %s1112_s21 }
  0x22   :  { %s102_s28 = sshrl.u32 %s1146_s24, 2  ;;  %s644_s29 = scalar_lea.hbm %s643_s2, 8 }
  0x23   :  { %s103_s30 = sand.u32 3, %s1146_s24   ;;  %s92_s4 = sshll.u32 %s644_s29, 4  ;;  %s93_s4 = int_to_ptr.hbm [resolvable:$true] %s92_s4 }
  0x24   :  { %s818_s5 = sshll.u32 %s102_s28, 3  ;;  %s943_s7 = sshra.s32 %s93_s4, 4  ;;  %s944_s7 = int_to_ptr.hbm [resolvable:$true] %s943_s7 }
  0x25   :  { %s652_s6 = sadd.s32 %s818_s5, %s103_s30  ;;  %s945_s8 = scalar_lea.hbm %s944_s7, 2 }
  0x26   :  { %p946_p5 = scmp.ne.s32.totalorder %s944_s7, %s945_s8  ;;  %p948_p6 = scmp.lt.s32.totalorder %s944_s7, %s1248_s1 }
  0x27   :  { %p949_p7 = scmp.lt.s32.totalorder %s1160_s17, %s945_s8 }
  0x29   :  { %p950_p8 = por %p949_p7, %p948_p6 }
  0x2b   :  { %p951_p9 = pnand %p950_p8, %p946_p5 }
  0x2d   :  { %954 = shalt.err (!%p951_p9)  }
  0x2e   :  { %99 = dma.hbm_to_vmem [thread:$0]  %s93_s4, 32, %s95_s26, [#allocation3 + $0x1], %s1110_s20, %s1111_s0, %s1112_s21 }
  0x2f   :  { %s653_s10 = scalar_lea.hbm %s1248_s1, %s652_s6  ;;  %s819_s12 = sld [smem:[#allocation5 + $0x3]] }
  0x30   :  { %s654_s13 = scalar_lea.hbm %s653_s10, 16  ;;  %s1113_s15 = smov [#allocation2 + $0x3]  }
  0x31   :  { %s113_s14 = sshll.u32 %s654_s13, 4  ;;  %s1188_s16 = sshll.u32 %s1113_s15, 4  ;;  %s114_s14 = int_to_ptr.hbm [resolvable:$true] %s113_s14  ;;  %s137_s16 = int_to_ptr.vmem [resolvable:$true] %s1188_s16 }
  0x32   :  { %s967_s18 = sshra.s32 %s114_s14, 4  ;;  %s968_s18 = int_to_ptr.hbm [resolvable:$true] %s967_s18 }
  0x33   :  { %s969_s19 = scalar_lea.hbm %s968_s18, 2  ;;  %p972_p11 = scmp.lt.s32.totalorder %s968_s18, %s1248_s1 }
  0x34   :  { %p970_p10 = scmp.ne.s32.totalorder %s968_s18, %s969_s19  ;;  %p973_p12 = scmp.lt.s32.totalorder %s1160_s17, %s969_s19 }
  0x36   :  { %p974_p13 = por %p973_p12, %p972_p11 }
  0x38   :  { %p975_p0 = pnand %p974_p13, %p970_p10 }
  0x3a   :  { %978 = shalt.err (!%p975_p0)  }
  0x3b   :  { %120 = dma.hbm_to_vmem [thread:$0]  %s114_s14, 32, %s116_s27, [#allocation3 + $0x2], %s1110_s20, %s1111_s0, %s1112_s21 }
  0x3c   :  { %s1200_s26 = sld [smem:[#allocation5 + $0x4]]  ;;  %s123_s2 = sshrl.u32 %s819_s12, 2 }
  0x3d   :  { %s124_s28 = sand.u32 3, %s819_s12   ;;  %s820_s29 = sshll.u32 %s123_s2, 3 }
  0x3e   :  { %s1114_s30 = smov [#allocation2 + $0x4]   ;;  %s662_s5 = sadd.s32 %s820_s29, %s124_s28 }
  0x3f   :  { %s1202_s4 = sshll.u32 %s1114_s30, 4  ;;  %s663_s8 = scalar_lea.hbm %s1248_s1, %s662_s5  ;;  %s158_s4 = int_to_ptr.vmem [resolvable:$true] %s1202_s4 }
  0x40   :  { %s823_s9 = sld [smem:[#allocation5 + $0x5]]  ;;  %s664_s27 = scalar_lea.hbm %s663_s8, 24 }
  0x41   :  { %s134_s11 = sshll.u32 %s664_s27, 4  ;;  %s135_s11 = int_to_ptr.hbm [resolvable:$true] %s134_s11 }
  0x42   :  { %s144_s22 = sshrl.u32 %s1200_s26, 2  ;;  %s145_s24 = sand.u32 3, %s1200_s26  }
  0x43   :  { %s991_s10 = sshra.s32 %s135_s11, 4  ;;  %s992_s10 = int_to_ptr.hbm [resolvable:$true] %s991_s10 }
  0x44   :  { %s993_s12 = scalar_lea.hbm %s992_s10, 2  ;;  %p996_p2 = scmp.lt.s32.totalorder %s992_s10, %s1248_s1 }
  0x45   :  { %p994_p1 = scmp.ne.s32.totalorder %s992_s10, %s993_s12  ;;  %p997_p3 = scmp.lt.s32.totalorder %s1160_s17, %s993_s12 }
  0x47   :  { %p998_p4 = por %p997_p3, %p996_p2 }
  0x49   :  { %p999_p5 = pnand %p998_p4, %p994_p1 }
  0x4b   :  { %1002 = shalt.err (!%p999_p5)  }
  0x4c   :  { %141 = dma.hbm_to_vmem [thread:$0]  %s135_s11, 32, %s137_s16, [#allocation3 + $0x3], %s1110_s20, %s1111_s0, %s1112_s21 }
  0x4d   :  { %s822_s15 = sshll.u32 %s144_s22, 3  ;;  %s1115_s18 = smov [#allocation2 + $0x5]  }
  0x4e   :  { %s1219_s19 = sshll.u32 %s1115_s18, 4  ;;  %s672_s23 = sadd.s32 %s822_s15, %s145_s24  ;;  %s179_s19 = int_to_ptr.vmem [resolvable:$true] %s1219_s19 }
  0x4f   :  { %s165_s25 = sshrl.u32 %s823_s9, 2  ;;  %s673_s28 = scalar_lea.hbm %s1248_s1, %s672_s23 }
  0x50   :  { %s166_s29 = sand.u32 3, %s823_s9   ;;  %s674_s30 = scalar_lea.hbm %s673_s28, 32 }
  0x51   :  { %s824_s5 = sshll.u32 %s165_s25, 3  ;;  %s155_s6 = sshll.u32 %s674_s30, 4  ;;  %s156_s6 = int_to_ptr.hbm [resolvable:$true] %s155_s6 }
  0x52   :  { %s682_s7 = sadd.s32 %s824_s5, %s166_s29  ;;  %s1015_s11 = sshra.s32 %s156_s6, 4  ;;  %s1016_s11 = int_to_ptr.hbm [resolvable:$true] %s1015_s11 }
  0x53   :  { %s683_s16 = scalar_lea.hbm %s1248_s1, %s682_s7  ;;  %s1017_s22 = scalar_lea.hbm %s1016_s11, 2 }
  0x54   :  { %p1018_p6 = scmp.ne.s32.totalorder %s1016_s11, %s1017_s22  ;;  %p1020_p7 = scmp.lt.s32.totalorder %s1016_s11, %s1248_s1 }
  0x55   :  { %p1021_p8 = scmp.lt.s32.totalorder %s1160_s17, %s1017_s22 }
  0x57   :  { %p1022_p9 = por %p1021_p8, %p1020_p7 }
  0x59   :  { %p1023_p10 = pnand %p1022_p9, %p1018_p6 }
  0x5b   :  { %1026 = shalt.err (!%p1023_p10)  }
  0x5c   :  { %162 = dma.hbm_to_vmem [thread:$0]  %s156_s6, 32, %s158_s4, [#allocation3 + $0x4], %s1110_s20, %s1111_s0, %s1112_s21 }
  0x5d   :  { %s684_s9 = scalar_lea.hbm %s683_s16, 40 }
  0x5e   :  { %s176_s12 = sshll.u32 %s684_s9, 4  ;;  %s177_s12 = int_to_ptr.hbm [resolvable:$true] %s176_s12 }
  0x5f   :  { %s1039_s13 = sshra.s32 %s177_s12, 4  ;;  %s1040_s13 = int_to_ptr.hbm [resolvable:$true] %s1039_s13 }
  0x60   :  { %s1041_s14 = scalar_lea.hbm %s1040_s13, 2  ;;  %p1044_p12 = scmp.lt.s32.totalorder %s1040_s13, %s1248_s1 }
  0x61   :  { %p1042_p11 = scmp.ne.s32.totalorder %s1040_s13, %s1041_s14  ;;  %p1045_p13 = scmp.lt.s32.totalorder %s1160_s17, %s1041_s14 }
  0x63   :  { %p1046_p0 = por %p1045_p13, %p1044_p12 }
  0x65   :  { %p1047_p1 = pnand %p1046_p0, %p1042_p11 }
  0x67   :  { %1050 = shalt.err (!%p1047_p1)  }
  0x68   :  { %183 = dma.hbm_to_vmem [thread:$0]  %s177_s12, 32, %s179_s19, [#allocation3 + $0x5], %s1110_s20, %s1111_s0, %s1112_s21 }
  0x69   :  { %1091 = dma.done.wait [#allocation3], 32 }
  0x6a   :  { %1092 = vsyncadd [#allocation3], 4294967264 }
  0x6b   :  { %1093 = dma.done.wait [#allocation3 + $0x1], 32 }
  0x6c   :  { %1094 = vsyncadd [#allocation3 + $0x1], 4294967264 }
  0x6d   :  { %1095 = dma.done.wait [#allocation3 + $0x2], 32 }
  0x6e   :  { %1096 = vsyncadd [#allocation3 + $0x2], 4294967264 }
  0x6f   :  { %1097 = dma.done.wait [#allocation3 + $0x3], 32 }
  0x70   :  { %1098 = vsyncadd [#allocation3 + $0x3], 4294967264 }
  0x71   :  { %1099 = dma.done.wait [#allocation3 + $0x4], 32 }
  0x72   :  { %1100 = vsyncadd [#allocation3 + $0x4], 4294967264 }
  0x73   :  { %1101 = dma.done.wait [#allocation3 + $0x5], 32 }
  0x74   :  { %1102 = vsyncadd [#allocation3 + $0x5], 4294967264  ;;  %v445_v0 = vld [vmem:[#allocation2] sm:$0xff]  ;;  %v446_v1 = vld [vmem:[#allocation2 + $0x8] sm:$0xff]  ;;  %v486_v37 = vlaneseq  ;;  %vm493_vm3 = vcmask 7168   ;;  %s1116_s1 = smov [#allocation9]  }
  0x75   :  { %v455_v2 = vand.u32 2147483647, %v445_v0  ;;  %v456_v3 = vand.u32 2147483647, %v446_v1  ;;  %v447_v12 = vld [vmem:[#allocation6] sm:$0xff]  ;;  %v448_v15 = vld [vmem:[#allocation6 + $0x8] sm:$0xff] }
  0x76   :  { %v449_v17 = vmax.f32 %v445_v0, 0.0  ;;  %v451_v18 = vmul.f32 %v447_v12, %v445_v0  ;;  %v450_v21 = vmax.f32 %v446_v1, 0.0  ;;  %v452_v22 = vmul.f32 %v448_v15, %v446_v1  ;;  %s511_s17 = sshll.u32 %s1116_s1, 4  ;;  %s513_s21 = sshll.u32 %s1250_s3, 4  ;;  %s512_s17 = int_to_ptr.vmem [resolvable:$true] %s511_s17  ;;  %s514_s21 = int_to_ptr.hbm [resolvable:$true] %s513_s21 }
  0x77   :  { %v457_v4 = vsub.f32 0.0, %v455_v2  ;;  %v458_v5 = vsub.f32 0.0, %v456_v3  ;;  %v487_v38 = vshrl.u32 %v486_v37, 7 }
  0x78   :  { %v453_v26 = vsub.f32 %v449_v17, %v451_v18  ;;  %v454_v29 = vsub.f32 %v450_v21, %v452_v22 }
  0x79   :  { %v459_v6 = vmul.f32 1.442695, %v457_v4  ;;  %v461_v7 = vmul.f32 1.442695, %v458_v5  ;;  %vm491_vm2 = vcmp.lt.s32.totalorder %v487_v38, 6 }
  0x7b   :  { %875 = vpow2.f32 %v459_v6 }
  0x7c   :  { %877 = vpow2.f32 %v461_v7 }
  0x81   :  { %v876_v8 = vpop.eup %875 }
  0x82   :  { %v878_v9 = vpop.eup %877  ;;  %v463_v10 = vadd.f32 1.0, %v876_v8  ;;  %v466_v11 = vmul.f32 -0.5, %v876_v8  ;;  %v469_v19 = vand.u32 2147483647, %v876_v8 }
  0x83   :  { %v472_v13 = vadd.f32 1.0, %v878_v9  ;;  %v475_v14 = vmul.f32 -0.5, %v878_v9  ;;  %v478_v23 = vand.u32 2147483647, %v878_v9 }
  0x84   :  { %879 = vlog2.f32 %v463_v10  ;;  %v467_v16 = vadd.f32 1.0, %v466_v11  ;;  %vm470_vm0 = vcmp.lt.f32.partialorder %v469_v19, 0.0004427343 }
  0x85   :  { %881 = vlog2.f32 %v472_v13  ;;  %v476_v20 = vadd.f32 1.0, %v475_v14  ;;  %vm479_vm1 = vcmp.lt.f32.partialorder %v478_v23, 0.0004427343 }
  0x86   :  { %v468_v24 = vmul.f32 %v876_v8, %v467_v16 }
  0x87   :  { %v477_v27 = vmul.f32 %v878_v9, %v476_v20 }
  0x8a   :  { %v880_v25 = vpop.eup %879 }
  0x8b   :  { %v882_v28 = vpop.eup %881  ;;  %v465_v30 = vmul.f32 0.6931472, %v880_v25 }
  0x8c   :  { %v474_v31 = vmul.f32 0.6931472, %v882_v28 }
  0x8d   :  { %v471_v32 = vsel %vm470_vm0, %v468_v24, %v465_v30 }
  0x8e   :  { %v480_v33 = vsel %vm479_vm1, %v477_v27, %v474_v31  ;;  %v481_v34 = vadd.f32 %v471_v32, %v453_v26 }
  0x8f   :  { %v482_v35 = vadd.f32 %v480_v33, %v454_v29 }
  0x91   :  { %v483_v36 = vadd.f32 %v482_v35, %v481_v34 }
  0x93   :  { %484 = vadd.xlane.f32.xlu0 %v483_v36 }
 0x106   :  { %v485_v39 = vpop.xlane.xlu0 %484 }
 0x107   :  { %v492_v40 = vsel %vm491_vm2, %v485_v39, 0.0 }
 0x108   :  { %v494_v41 = vsel %vm493_vm3, %v492_v40, 0.0 }
 0x109   :  { %495 = vadd.xlane.f32.xlu0 %v494_v41 }
 0x17c   :  { %v496_v42 = vpop.xlane.xlu0 %495 }
 0x17d   :  { %v497_v43 = vrot.slane %v496_v42, 4 }
 0x17f   :  { %v498_v44 = vadd.f32 %v497_v43, %v496_v42 }
 0x181   :  { %v499_v45 = vrot.slane %v498_v44, 2 }
 0x183   :  { %v500_v46 = vadd.f32 %v499_v45, %v498_v44 }
 0x185   :  { %v501_v47 = vrot.slane %v500_v46, 1 }
 0x187   :  { %v502_v48 = vadd.f32 %v501_v47, %v500_v46 }
 0x189   :  { %861 = vpush %v502_v48 }
 0x1ba   :  { %s862_s4 = spop %861 }
 0x1bb   :  { %v504_v49 = vstv %s862_s4 }
 0x1bc   :  { %505 = vst [vmem:[#allocation9] sm:$0xff] %v504_v49 }
 0x1bd   :  { %516 = dma.vmem_to_hbm [thread:$0]  %s512_s17, 128, %s514_s21, [#allocation8]  }
 0x1be   :  { %1103 = dma.done.wait [#allocation8], 128  }
 0x1bf   :  { %1104 = vsyncadd [#allocation8], 4294967168 }
 0x1c0   :  { %521 = vsyncpa [#allocation7], 1 }
 0x1c1   :  { %522 = vsyncpa [#allocation8], 1 }
 0x1c2   :  { %523 = vsyncmov [#allocation3] }
 0x1c5   :  { %s524_s19 = vpop.sfrf %523 }
 0x1c6   :  { %p845_p2 = scmp.ne.s32.totalorder %s524_s19, 0 }
 0x1c8   :  { %528 = shalt.err (%p845_p2)  }
 0x1c9   :  { %530 = vsyncmov [#allocation3 + $0x1] }
 0x1cc   :  { %s531_s23 = vpop.sfrf %530 }
 0x1cd   :  { %p846_p3 = scmp.ne.s32.totalorder %s531_s23, 0 }
 0x1cf   :  { %535 = shalt.err (%p846_p3)  }
 0x1d0   :  { %537 = vsyncmov [#allocation3 + $0x2] }
 0x1d3   :  { %s538_s3 = vpop.sfrf %537 }
 0x1d4   :  { %p847_p4 = scmp.ne.s32.totalorder %s538_s3, 0 }
 0x1d6   :  { %542 = shalt.err (%p847_p4)  }
 0x1d7   :  { %544 = vsyncmov [#allocation3 + $0x3] }
 0x1da   :  { %s545_s25 = vpop.sfrf %544 }
 0x1db   :  { %p848_p5 = scmp.ne.s32.totalorder %s545_s25, 0 }
 0x1dd   :  { %549 = shalt.err (%p848_p5)  }
 0x1de   :  { %551 = vsyncmov [#allocation3 + $0x4] }
 0x1e1   :  { %s552_s26 = vpop.sfrf %551 }
 0x1e2   :  { %p849_p6 = scmp.ne.s32.totalorder %s552_s26, 0 }
 0x1e4   :  { %556 = shalt.err (%p849_p6)  }
 0x1e5   :  { %558 = vsyncmov [#allocation3 + $0x5] }
 0x1e8   :  { %s559_s2 = vpop.sfrf %558 }
 0x1e9   :  { %p850_p7 = scmp.ne.s32.totalorder %s559_s2, 0 }
 0x1eb   :  { %563 = shalt.err (%p850_p7)  }
 0x1ec   :  { %565 = vsyncmov [#allocation3 + $0x6] }
 0x1ef   :  { %s566_s28 = vpop.sfrf %565 }
 0x1f0   :  { %p851_p8 = scmp.ne.s32.totalorder %s566_s28, 0 }
 0x1f2   :  { %570 = shalt.err (%p851_p8)  }
 0x1f3   :  { %572 = vsyncmov [#allocation3 + $0x7] }
 0x1f6   :  { %s573_s29 = vpop.sfrf %572 }
 0x1f7   :  { %p852_p9 = scmp.ne.s32.totalorder %s573_s29, 0 }
 0x1f9   :  { %577 = shalt.err (%p852_p9)  }
 0x1fa   :  { %579 = vsyncmov [#allocation3 + $0x8] }
 0x1fd   :  { %s580_s30 = vpop.sfrf %579 }
 0x1fe   :  { %p853_p10 = scmp.ne.s32.totalorder %s580_s30, 0 }
 0x200   :  { %584 = shalt.err (%p853_p10)  }
 0x201   :  { %586 = vsyncmov [#allocation3 + $0x9] }
 0x204   :  { %s587_s5 = vpop.sfrf %586 }
 0x205   :  { %p854_p11 = scmp.ne.s32.totalorder %s587_s5, 0 }
 0x207   :  { %591 = shalt.err (%p854_p11)  }
 0x208   :  { %593 = vsyncmov [#allocation3 + $0xa] }
 0x20b   :  { %s594_s6 = vpop.sfrf %593 }
 0x20c   :  { %p855_p12 = scmp.ne.s32.totalorder %s594_s6, 0 }
 0x20e   :  { %598 = shalt.err (%p855_p12)  }
 0x20f   :  { %600 = vsyncmov [#allocation3 + $0xb] }
 0x212   :  { %s601_s7 = vpop.sfrf %600 }
 0x213   :  { %p856_p13 = scmp.ne.s32.totalorder %s601_s7, 0 }
 0x215   :  { %605 = shalt.err (%p856_p13)  }
 0x216   :  { %607 = vsyncmov [#allocation3 + $0xc] }
 0x219   :  { %s608_s8 = vpop.sfrf %607 }
 0x21a   :  { %p857_p0 = scmp.ne.s32.totalorder %s608_s8, 0 }
 0x21c   :  { %612 = shalt.err (%p857_p0)  }
 0x21d   :  { %614 = vsyncmov [#allocation3 + $0xd] }
 0x220   :  { %s615_s27 = vpop.sfrf %614 }
 0x221   :  { %p858_p1 = scmp.ne.s32.totalorder %s615_s27, 0 }
 0x223   :  { %619 = shalt.err (%p858_p1)  }
 0x224   :  { %621 = vsyncmov [#allocation3 + $0xe] }
 0x227   :  { %s622_s16 = vpop.sfrf %621 }
 0x228   :  { %p859_p2 = scmp.ne.s32.totalorder %s622_s16, 0 }
 0x22a   :  { %626 = shalt.err (%p859_p2)  }
 0x22b   :  { %628 = vsyncmov [#allocation3 + $0xf] }
 0x22e   :  { %s629_s11 = vpop.sfrf %628 }
 0x22f   :  { %p860_p3 = scmp.ne.s32.totalorder %s629_s11, 0 }
 0x231   :  { %633 = shalt.err (%p860_p3)  }

</bundles_post_ra>
